<compile_context>
chip_gen: v6e
topology: v6e:2x2x1
jax: 0.10.0
libtpu: 0.0.40
codegen_flags: <defaults>
</compile_context>

<pallas_src>
import functools

import jax
import jax.numpy as jnp
from jax.experimental import pallas as pl
from jax.experimental.pallas import tpu as pltpu


def _round_up(x, m):
    return (x + m - 1) // m * m


def avgpool_embed_kernel(x_ref, w_ref, b_ref, gamma_ref, beta_ref, o_ref,
                         pooled_acc, *, inv_hw):
    """Grid axis 0 streams spatial (HW) tiles; it is a reduction ('arbitrary').

    x_ref:      (B, C, thw)   current spatial tile of the activations
    w_ref:      (E, C)        Linear weight, PyTorch layout, contracted on C
    b/gamma/beta: (1, E)
    o_ref:      (B, E)        output, written only on the last grid step
    pooled_acc: (B, C) f32    persistent accumulator for the spatial sum
    """
    step = pl.program_id(0)

    @pl.when(step == 0)
    def _init():
        pooled_acc[...] = jnp.zeros_like(pooled_acc)

    # Accumulate the global-average-pool numerator for this spatial tile.
    pooled_acc[...] += jnp.sum(x_ref[...].astype(jnp.float32), axis=-1)

    @pl.when(step == pl.num_programs(0) - 1)
    def _finalize():
        pooled = pooled_acc[...] * inv_hw                                  # (B, C)
        # Linear(C -> E): contract pooled's C with weight's C (weight is (E, C)).
        emb = jax.lax.dot_general(
            pooled, w_ref[...],
            dimension_numbers=(((1,), (1,)), ((), ())),
            preferred_element_type=jnp.float32) + b_ref[...]               # (B, E)
        # BatchNorm1d, training-mode batch statistics (biased var), eps = 1e-5.
        mu = jnp.mean(emb, axis=0, keepdims=True)
        var = jnp.mean((emb - mu) ** 2, axis=0, keepdims=True)
        bn = (emb - mu) * jax.lax.rsqrt(var + 1e-5) * gamma_ref[...] + beta_ref[...]
        # F.normalize(p=2, dim=1), eps=1e-12:  bn / max(||bn||, 1e-12)
        #   == bn * rsqrt(max(||bn||^2, 1e-24))   (EUP rsqrt, no divide).
        nrm2 = jnp.sum(bn * bn, axis=1, keepdims=True)                     # (B, 1)
        o_ref[...] = (bn * jax.lax.rsqrt(jnp.maximum(nrm2, 1e-24))).astype(o_ref.dtype)


def avg_pooling_forward(x, weight, bias, bn_gamma, bn_beta, *, tile_hw=None,
                        vmem_budget_bytes=32 * 1024 * 1024):
    """x: (B, C, H, W), weight: (E, C), bias/gamma/beta: (E,).  Returns (B, E) f32."""
    B, C, H, W = x.shape
    E, C_w = weight.shape
    assert C_w == C, "weight must be (E, C)"
    HW = H * W

    # Keep the activation dtype (bf16 inputs stream at half the HBM cost).
    x3 = x.reshape(B, C, HW)
    itemsize = x3.dtype.itemsize

    # ---- spatial (lane) tile: multiple of 128, sized so the double-buffered
    # x tile stays well inside a VMEM budget safe for v5e/v6e/v7x. -------------
    if tile_hw is None:
        c_pad = _round_up(C, 8)                           # sublane padding
        bytes_per_lane = 2 * B * c_pad * itemsize         # x tile, double-buffered
        max_thw = max(128, ((vmem_budget_bytes // 2) // bytes_per_lane) // 128 * 128)
        tile_hw = int(min(2048, max_thw, _round_up(HW, 128)))
    tile_hw = max(128, _round_up(int(tile_hw), 128))
    hw_pad = _round_up(HW, tile_hw)
    if hw_pad != HW:
        # Zero-pad the spatial axis: zeros do not change the pooled sum and the
        # kernel divides by the true HW.
        x3 = jnp.pad(x3, ((0, 0), (0, 0), (0, hw_pad - HW)))
    grid = (hw_pad // tile_hw,)

    w = weight.astype(jnp.float32)                        # (E, C), no transposed copy
    b2 = bias.reshape(1, E).astype(jnp.float32)
    g2 = bn_gamma.reshape(1, E).astype(jnp.float32)
    be2 = bn_beta.reshape(1, E).astype(jnp.float32)

    # VMEM actually needed (with (8,128) physical padding), plus headroom.
    vmem_need = (
        2 * B * _round_up(C, 8) * tile_hw * itemsize       # x, double-buffered
        + _round_up(E, 8) * _round_up(C, 128) * 4          # weight
        + 3 * 8 * _round_up(E, 128) * 4                    # bias / gamma / beta
        + _round_up(B, 8) * _round_up(E, 128) * 4          # output
        + _round_up(B, 8) * _round_up(C, 128) * 4          # pooled scratch
    )
    vmem_limit = int(min(max(2 * vmem_need, 16 * 1024 * 1024), 64 * 1024 * 1024))

    cost = pl.CostEstimate(
        flops=B * C * HW + 2 * B * C * E + 10 * B * E,
        transcendentals=B + E,
        bytes_accessed=B * C * HW * itemsize + E * C * 4 + (3 * E + B * E) * 4,
    )

    kernel = functools.partial(avgpool_embed_kernel, inv_hw=1.0 / float(HW))

    return pl.pallas_call(
        kernel,
        out_shape=jax.ShapeDtypeStruct((B, E), jnp.float32),
        grid_spec=pltpu.PrefetchScalarGridSpec(
            num_scalar_prefetch=0,
            grid=grid,
            in_specs=[
                # Streamed: one (B, C, tile_hw) spatial tile per grid step.
                pl.BlockSpec((B, C, tile_hw), lambda s: (0, 0, s)),
                # Small parameters: constant block index -> resident, no re-DMA.
                pl.BlockSpec((E, C), lambda s: (0, 0)),
                pl.BlockSpec((1, E), lambda s: (0, 0)),
                pl.BlockSpec((1, E), lambda s: (0, 0)),
                pl.BlockSpec((1, E), lambda s: (0, 0)),
            ],
            out_specs=pl.BlockSpec((B, E), lambda s: (0, 0)),
            scratch_shapes=[pltpu.VMEM((B, C), jnp.float32)],
        ),
        compiler_params=pltpu.CompilerParams(
            dimension_semantics=("arbitrary",),            # HW axis is a reduction
            vmem_limit_bytes=vmem_limit,
        ),
        cost_estimate=cost,
    )(x3, w, b2, g2, be2)


def reference_forward(x, weight, bias, bn_gamma, bn_beta):
    B, C, H, W = x.shape
    pooled = jnp.mean(x.astype(jnp.float32).reshape(B, C, H * W), axis=-1)
    emb = pooled @ weight.T.astype(jnp.float32) + bias
    mu = jnp.mean(emb, axis=0, keepdims=True)
    var = jnp.mean((emb - mu) ** 2, axis=0, keepdims=True)
    bn = (emb - mu) / jnp.sqrt(var + 1e-5) * bn_gamma + bn_beta
    nrm = jnp.sqrt(jnp.sum(bn * bn, axis=1, keepdims=True))
    return bn / jnp.maximum(nrm, 1e-12)


if __name__ == "__main__":
    B, C, H, W = 2, 4, 16, 16            # input_feature_size = C = 4
    E = 128                              # embeding_fea_size (small, lane-aligned)

    key = jax.random.PRNGKey(0)
    kx, kw = jax.random.split(key)

    x = jax.random.normal(kx, (B, C, H, W), dtype=jnp.float32)

    # Deterministic parameter init matching the module's __init__:
    #   kaiming_normal_(weight, mode='fan_out') -> std = sqrt(2 / fan_out) = sqrt(2/E)
    #   bias = 0, bn weight = 1, bn bias = 0
    weight = jax.random.normal(kw, (E, C), dtype=jnp.float32) * jnp.sqrt(2.0 / E)
    bias = jnp.zeros((E,), dtype=jnp.float32)
    bn_gamma = jnp.ones((E,), dtype=jnp.float32)
    bn_beta = jnp.zeros((E,), dtype=jnp.float32)

    # Force tile_hw=128 so the demo exercises a multi-step grid (HW=256 -> 2 steps)
    # and the init/accumulate/finalize pl.when paths.
    out = avg_pooling_forward(x, weight, bias, bn_gamma, bn_beta, tile_hw=128)
    out = jax.block_until_ready(out)

    ref = reference_forward(x, weight, bias, bn_gamma, bn_beta)
    assert out.shape == (B, E)
    assert jnp.allclose(out, ref, rtol=1e-4, atol=1e-4), "mismatch vs JAX reference"

    print("KERNEL_OK")
</pallas_src>

<mosaic_0001>
module attributes {stable_mosaic.version = 11 : i64} {
  func.func @avgpool_embed_kernel(%arg0: i32, %arg1: memref<2x4x128xf32, #tpu.memory_space<vmem>>, %arg2: memref<128x4xf32, #tpu.memory_space<vmem>>, %arg3: memref<1x128xf32, #tpu.memory_space<vmem>>, %arg4: memref<1x128xf32, #tpu.memory_space<vmem>>, %arg5: memref<1x128xf32, #tpu.memory_space<vmem>>, %arg6: memref<2x128xf32, #tpu.memory_space<vmem>>, %arg7: memref<2x4xf32, #tpu.memory_space<vmem>>) attributes {dimension_semantics = [#tpu.dimension_semantics<arbitrary>], iteration_bounds = array<i64: 2>, scalar_prefetch = 0 : i64, scratch_operands = 1 : i64, tpu.core_type = #tpu.core_type<tc>, window_params = [{transform_indices = @transform_0, window_bounds = array<i64: 2, 4, 128>}, {pipeline_mode = #tpu.pipeline_mode<synchronous>, transform_indices = @transform_1, window_bounds = array<i64: 128, 4>}, {pipeline_mode = #tpu.pipeline_mode<synchronous>, transform_indices = @transform_2, window_bounds = array<i64: 1, 128>}, {pipeline_mode = #tpu.pipeline_mode<synchronous>, transform_indices = @transform_3, window_bounds = array<i64: 1, 128>}, {pipeline_mode = #tpu.pipeline_mode<synchronous>, transform_indices = @transform_4, window_bounds = array<i64: 1, 128>}, {pipeline_mode = #tpu.pipeline_mode<synchronous>, transform_indices = @transform_5, window_bounds = array<i64: 2, 128>}]} {
    %c0_i32 = arith.constant 0 : i32
    %0 = arith.cmpi eq, %arg0, %c0_i32 : i32
    %1 = arith.extui %0 : i1 to i32
    %c0_i32_0 = arith.constant 0 : i32
    %2 = arith.cmpi ne, %1, %c0_i32_0 : i32
    scf.if %2 {
      %cst_8 = arith.constant 0.000000e+00 : f32
      %11 = vector.broadcast %cst_8 : f32 to vector<2x4xf32>
      %c0_9 = arith.constant 0 : index
      %c0_10 = arith.constant 0 : index
      %12 = vector.load %arg7[%c0_9, %c0_10] : memref<2x4xf32, #tpu.memory_space<vmem>>, vector<2x4xf32>
      tpu.vector_store %arg7[%c0_9, %c0_10], %11 {strides = array<i32>} : memref<2x4xf32, #tpu.memory_space<vmem>>, vector<2x4xf32>,
    } else {
    }
    %c0 = arith.constant 0 : index
    %c0_1 = arith.constant 0 : index
    %3 = vector.load %arg7[%c0, %c0_1] : memref<2x4xf32, #tpu.memory_space<vmem>>, vector<2x4xf32>
    %c0_2 = arith.constant 0 : index
    %c0_3 = arith.constant 0 : index
    %c0_4 = arith.constant 0 : index
    %4 = vector.load %arg1[%c0_2, %c0_3, %c0_4] : memref<2x4x128xf32, #tpu.memory_space<vmem>>, vector<2x4x128xf32>
    %cst = arith.constant dense<0.000000e+00> : vector<2x4xf32>
    %5 = vector.multi_reduction <add>, %4, %cst [2] : vector<2x4x128xf32> to vector<2x4xf32>
    %6 = arith.addf %3, %5 : vector<2x4xf32>
    %c0_5 = arith.constant 0 : index
    %c0_6 = arith.constant 0 : index
    %7 = vector.load %arg7[%c0_5, %c0_6] : memref<2x4xf32, #tpu.memory_space<vmem>>, vector<2x4xf32>
    tpu.vector_store %arg7[%c0_5, %c0_6], %6 {strides = array<i32>} : memref<2x4xf32, #tpu.memory_space<vmem>>, vector<2x4xf32>,
    %c1_i32 = arith.constant 1 : i32
    %8 = arith.cmpi eq, %arg0, %c1_i32 : i32
    %9 = arith.extui %8 : i1 to i32
    %c0_i32_7 = arith.constant 0 : i32
    %10 = arith.cmpi ne, %9, %c0_i32_7 : i32
    scf.if %10 {
      %c0_8 = arith.constant 0 : index
      %c0_9 = arith.constant 0 : index
      %11 = vector.load %arg7[%c0_8, %c0_9] : memref<2x4xf32, #tpu.memory_space<vmem>>, vector<2x4xf32>
      %cst_10 = arith.constant 3.906250e-03 : f32
      %12 = vector.broadcast %cst_10 : f32 to vector<2x4xf32>
      %13 = arith.mulf %11, %12 : vector<2x4xf32>
      %c0_11 = arith.constant 0 : index
      %c0_12 = arith.constant 0 : index
      %14 = vector.load %arg2[%c0_11, %c0_12] : memref<128x4xf32, #tpu.memory_space<vmem>>, vector<128x4xf32>
      %cst_13 = arith.constant dense<0.000000e+00> : vector<2x128xf32>
      %15 = tpu.matmul %13, %14, %cst_13 {dimension_numbers = #tpu.dot_dimension_numbers<[1], [1], [0], [0], [0, 0, 1, 0], [], []>} : vector<2x4xf32>, vector<128x4xf32>, vector<2x128xf32> -> vector<2x128xf32>
      %c0_14 = arith.constant 0 : index
      %c0_15 = arith.constant 0 : index
      %16 = vector.load %arg3[%c0_14, %c0_15] : memref<1x128xf32, #tpu.memory_space<vmem>>, vector<1x128xf32>
      %17 = vector.broadcast %16 : vector<1x128xf32> to vector<2x128xf32>
      %18 = arith.addf %15, %17 : vector<2x128xf32>
      %cst_16 = arith.constant dense<0.000000e+00> : vector<128xf32>
      %19 = vector.multi_reduction <add>, %18, %cst_16 [0] : vector<2x128xf32> to vector<128xf32>
      %20 = vector.shape_cast %19 : vector<128xf32> to vector<1x128xf32>
      %cst_17 = arith.constant 2.000000e+00 : f32
      %21 = vector.broadcast %cst_17 : f32 to vector<1x128xf32>
      %22 = arith.divf %20, %21 : vector<1x128xf32>
      %23 = vector.broadcast %22 : vector<1x128xf32> to vector<2x128xf32>
      %24 = arith.subf %18, %23 : vector<2x128xf32>
      %25 = arith.mulf %24, %24 : vector<2x128xf32>
      %cst_18 = arith.constant dense<0.000000e+00> : vector<128xf32>
      %26 = vector.multi_reduction <add>, %25, %cst_18 [0] : vector<2x128xf32> to vector<128xf32>
      %27 = vector.shape_cast %26 : vector<128xf32> to vector<1x128xf32>
      %cst_19 = arith.constant 2.000000e+00 : f32
      %28 = vector.broadcast %cst_19 : f32 to vector<1x128xf32>
      %29 = arith.divf %27, %28 : vector<1x128xf32>
      %30 = vector.broadcast %22 : vector<1x128xf32> to vector<2x128xf32>
      %31 = arith.subf %18, %30 : vector<2x128xf32>
      %cst_20 = arith.constant 9.99999974E-6 : f32
      %32 = vector.broadcast %cst_20 : f32 to vector<1x128xf32>
      %33 = arith.addf %29, %32 : vector<1x128xf32>
      %34 = math.rsqrt %33 : vector<1x128xf32>
      %35 = vector.broadcast %34 : vector<1x128xf32> to vector<2x128xf32>
      %36 = arith.mulf %31, %35 : vector<2x128xf32>
      %c0_21 = arith.constant 0 : index
      %c0_22 = arith.constant 0 : index
      %37 = vector.load %arg4[%c0_21, %c0_22] : memref<1x128xf32, #tpu.memory_space<vmem>>, vector<1x128xf32>
      %38 = vector.broadcast %37 : vector<1x128xf32> to vector<2x128xf32>
      %39 = arith.mulf %36, %38 : vector<2x128xf32>
      %c0_23 = arith.constant 0 : index
      %c0_24 = arith.constant 0 : index
      %40 = vector.load %arg5[%c0_23, %c0_24] : memref<1x128xf32, #tpu.memory_space<vmem>>, vector<1x128xf32>
      %41 = vector.broadcast %40 : vector<1x128xf32> to vector<2x128xf32>
      %42 = arith.addf %39, %41 : vector<2x128xf32>
      %43 = arith.mulf %42, %42 : vector<2x128xf32>
      %cst_25 = arith.constant dense<0.000000e+00> : vector<2xf32>
      %44 = vector.multi_reduction <add>, %43, %cst_25 [1] : vector<2x128xf32> to vector<2xf32>
      %45 = vector.shape_cast %44 : vector<2xf32> to vector<2x1xf32>
      %cst_26 = arith.constant 1.000000e-24 : f32
      %46 = vector.broadcast %cst_26 : f32 to vector<2x1xf32>
      %47 = arith.maximumf %45, %46 : vector<2x1xf32>
      %48 = math.rsqrt %47 : vector<2x1xf32>
      %49 = vector.broadcast %48 : vector<2x1xf32> to vector<2x128xf32>
      %50 = arith.mulf %42, %49 : vector<2x128xf32>
      %c0_27 = arith.constant 0 : index
      %c0_28 = arith.constant 0 : index
      %51 = vector.load %arg6[%c0_27, %c0_28] : memref<2x128xf32, #tpu.memory_space<vmem>>, vector<2x128xf32>
      tpu.vector_store %arg6[%c0_27, %c0_28], %50 {strides = array<i32>} : memref<2x128xf32, #tpu.memory_space<vmem>>, vector<2x128xf32>,
    } else {
    }
    return
  }
  func.func @transform_0(%arg0: i32) -> (i32, i32, i32) {
    %c0_i32 = arith.constant 0 : i32
    %c0_i32_0 = arith.constant 0 : i32
    %c0_i32_1 = arith.constant 0 : i32
    return %c0_i32, %c0_i32_0, %arg0 : i32, i32, i32
  }
  func.func @transform_1(%arg0: i32) -> (i32, i32) {
    %c0_i32 = arith.constant 0 : i32
    %c0_i32_0 = arith.constant 0 : i32
    %c0_i32_1 = arith.constant 0 : i32
    return %c0_i32, %c0_i32_0 : i32, i32
  }
  func.func @transform_2(%arg0: i32) -> (i32, i32) {
    %c0_i32 = arith.constant 0 : i32
    %c0_i32_0 = arith.constant 0 : i32
    %c0_i32_1 = arith.constant 0 : i32
    return %c0_i32, %c0_i32_0 : i32, i32
  }
  func.func @transform_3(%arg0: i32) -> (i32, i32) {
    %c0_i32 = arith.constant 0 : i32
    %c0_i32_0 = arith.constant 0 : i32
    %c0_i32_1 = arith.constant 0 : i32
    return %c0_i32, %c0_i32_0 : i32, i32
  }
  func.func @transform_4(%arg0: i32) -> (i32, i32) {
    %c0_i32 = arith.constant 0 : i32
    %c0_i32_0 = arith.constant 0 : i32
    %c0_i32_1 = arith.constant 0 : i32
    return %c0_i32, %c0_i32_0 : i32, i32
  }
  func.func @transform_5(%arg0: i32) -> (i32, i32) {
    %c0_i32 = arith.constant 0 : i32
    %c0_i32_0 = arith.constant 0 : i32
    %c0_i32_1 = arith.constant 0 : i32
    return %c0_i32, %c0_i32_0 : i32, i32
  }
}

</mosaic_0001>

<bundles_post_ra>
// kernel: tpu_custom_call.1
= control target key start
LH: loop header
LB: loop body
LE: loop exit
PB: predicated region body
PF: predicated region fallthrough
CT: control target
= control target key end

     0   :  { %10 = vsyncpa [#allocation5], 0  ;;  %s751_s18 = smov 0   ;;  %s753_s19 = smov 0   ;;  %s881_s0 = inlined_call_operand.vmem [shape: f32[2,4,256], index: 0, kind: input, shape index: {}]   ;;  %s882_s1 = inlined_call_operand.vmem [shape: f32[128,4], index: 1, kind: input, shape index: {}]   ;;  %s883_s2 = inlined_call_operand.vmem [shape: f32[1,128], index: 2, kind: input, shape index: {}]   ;;  %s884_s3 = inlined_call_operand.vmem [shape: f32[1,128], index: 3, kind: input, shape index: {}]   ;;  %s885_s4 = inlined_call_operand.vmem [shape: f32[1,128], index: 4, kind: input, shape index: {}]   ;;  %s886_s5 = inlined_call_operand.hbm [shape: f32[2,128], index: 5, kind: output, shape index: {}]  }
   0x1   :  { %s755_s20 = smov 0  }
   0x2 LB: > { %s764_s21 = sadd.s32 4294967295, %s715_s20   ;;  %s766_s22 = sadd.s32 1, %s715_s20   ;;  %s715_s20 = sphi %s755_s20, %s889_s20   ;;  %s711_s19 = sphi %s753_s19, %s888_s19   ;;  %s707_s18 = sphi %s751_s18, %s887_s18  }
   0x3   : > { %s20_s23 = ssub.s32 %s715_s20, %s766_s22  ;;  %s23_s24 = sadd.s32 1, %s711_s19 }
   0x4   : > { %p21_p0 = scmp.eq.s32.totalorder %s20_s23, 0  ;;  %p30_p1 = scmp.ne.s32.totalorder %s711_s19, %s707_s18 }
   0x5   : > { %p31_p2 = scmp.eq.s32.totalorder %s715_s20, 0  ;;  %p544_p4 = scmp.ge.s32.totalorder %s715_s20, 2 }
   0x6   : > { %s773_s25 = scalar_select %p21_p0, %s711_s19, %s23_s24  }
   0x7   : > { %p32_p3 = por %p31_p2, %p30_p1  ;;  %173 = sbr.rel (%p544_p4) target bundleno = 17 (0x11), region = 32 }
   0xc   : > { %176 = sbr.rel (!%p32_p3) target bundleno = 17 (0x11), region = 36  ;;  %s178_s26 = sand.u32 (%p32_p3), 1, %s711_s19  }
   0xd   : > { %s546_s27 = sshll.u32 (%p32_p3), %s715_s20, 2  ;;  %s545_s28 = sshll.u32 (%p32_p3), %s178_s26, 3 }
   0xe   : > { %s182_s6 = scalar_lea.vmem (%p32_p3), %s881_s0, %s546_s27  ;;  %s180_s7 = scalar_lea.vmem (%p32_p3), [#allocation3], %s545_s28 }
   0xf   : > { %v199_v0 = vld [vmem:[%s182_s6] sm:$0xf] (%p32_p3)  ;;  %v201_v1 = vld [vmem:[%s182_s6 + $0x8] sm:$0xf] (%p32_p3) }
  0x10   : > { %200 = vst [vmem:[%s180_s7] sm:$0xf] (%p32_p3), %v199_v0  ;;  %202 = vst [vmem:[%s180_s7 + $0x4] sm:$0xf] (%p32_p3), %v201_v1 }
  0x11 PF: > { %p547_p5 = scmp.ge.s32.totalorder %s715_s20, 1  ;;  %p229_p6 = scmp.lt.s32.totalorder %s715_s20, 3 }
  0x13   : > { %p230_p7 = pnand %p547_p5, %p229_p6 }
  0x14   : > { %s236_s8 = sand.u32 (!%p230_p7), 1, %s707_s18   ;;  %p549_p8 = scmp.ne.s32.totalorder (!%p230_p7), %s764_s21, 0 }
  0x15   : > { %233 = sbr.rel (%p230_p7) target bundleno = 674 (0x2a2), region = 77  ;;  %s548_s9 = sshll.u32 (!%p230_p7), %s236_s8, 3 }
  0x16   : > { %s238_s10 = scalar_lea.vmem (!%p230_p7), [#allocation3], %s548_s9 }
  0x1a   : > { %261 = sbr.rel (%p549_p8) target bundleno = 33 (0x21), region = 85 }
  0x1f   : > { %vm262_vm0 = vcmask 25600   ;;  %v717_v2 = vmov 0.0  }
  0x20   : > { %263 = vst.msk [vmem:[#allocation2] sm:$0x3] %vm262_vm0, %v717_v2 }
  0x21 PF: > { %v265_v3 = vld [vmem:[%s238_s10] sm:$0xf]  ;;  %vm267_vm1 = vcmask 1043456   ;;  %v266_v4 = vld [vmem:[%s238_s10 + $0x4] sm:$0xf]  ;;  %v276_v7 = vlaneseq  ;;  %vm286_vm2 = vcmask 1041409  }
  0x22   : > { %v268_v5 = vsel %vm267_vm1, %v265_v3, 0.0  ;;  %v271_v6 = vsel %vm267_vm1, %v266_v4, 0.0  ;;  %vm290_vm3 = vcmask 25600   ;;  %p550_p9 = scmp.ne.s32.totalorder %s764_s21, 1 }
  0x23   : > { %269 = vadd.xlane.f32.xlu0 %v268_v5  ;;  %v277_v8 = vand.u32 127, %v276_v7  ;;  %v279_v9 = vshrl.u32 %v276_v7, 7 }
  0x25   : > { %v280_v11 = vsub.s32 %v277_v8, %v279_v9 }
  0x27   : > { %272 = vadd.xlane.f32.xlu0 %v271_v6  ;;  %v264_v14 = vld [vmem:[#allocation2] sm:$0x3] }
  0xac   : > { %v270_v10 = vpop.xlane.xlu0 %269 }
  0xad   : > { %v281_v13 = vrot.slane %v270_v10, %v280_v11 }
  0xb0   : > { %v273_v12 = vpop.xlane.xlu0 %272 }
  0xb1   : > { %v285_v15 = vrot.slane %v273_v12, %v280_v11 }
  0xb2   : > { %295 = sbr.rel (%p550_p9) target bundleno = 659 (0x293), region = 89 }
  0xb3   : > { %v287_v16 = vsel %vm286_vm2, %v285_v15, %v281_v13 }
  0xb4   : > { %v289_v17 = vadd.f32 %v287_v16, %v264_v14 }
  0xb6   : > { %291 = vst.msk [vmem:[#allocation2] sm:$0x3] %vm290_vm3, %v289_v17 }
  0xb7   : > { %v313_v18 = vld [vmem:[%s882_s1 + $0x78] sm:$0xff]  ;;  %vm321_vm4 = vcmask 31744   ;;  %v718_v19 = vmov 0.0   ;;  %vm719_vm5 = vmmov 0   ;;  %v312_v20 = vld [vmem:[%s882_s1 + $0x70] sm:$0xff]  ;;  %v311_v21 = vld [vmem:[%s882_s1 + $0x68] sm:$0xff] }
  0xb8   : > { %592 = vmatprep.subr.mxu0 %v718_v19  ;;  %624 = vmatprep.mubr.msk.f32.mxu0 %vm719_vm5, %v718_v19  ;;  %v310_v22 = vld [vmem:[%s882_s1 + $0x60] sm:$0xff]  ;;  %v309_v23 = vld [vmem:[%s882_s1 + $0x58] sm:$0xff]  ;;  %v308_v24 = vld [vmem:[%s882_s1 + $0x50] sm:$0xff]  ;;  %vm443_vm6 = vcmask 1041408  }
  0xb9   : > { %593 = vmatpush3.xpose.msk.msra.mxu0 %vm321_vm4, %v313_v18  ;;  %v307_v25 = vld [vmem:[%s882_s1 + $0x48] sm:$0xff]  ;;  %v306_v26 = vld [vmem:[%s882_s1 + $0x40] sm:$0xff]  ;;  %v305_v27 = vld [vmem:[%s882_s1 + $0x38] sm:$0xff] }
  0xba   : > { %594 = vmatprep.subr.mxu0 %v718_v19  ;;  %v304_v28 = vld [vmem:[%s882_s1 + $0x30] sm:$0xff]  ;;  %v303_v29 = vld [vmem:[%s882_s1 + $0x28] sm:$0xff]  ;;  %v302_v30 = vld [vmem:[%s882_s1 + $0x20] sm:$0xff] }
  0xbb   : > { %v301_v31 = vld [vmem:[%s882_s1 + $0x18] sm:$0xff]  ;;  %v300_v32 = vld [vmem:[%s882_s1 + $0x10] sm:$0xff]  ;;  %v299_v33 = vld [vmem:[%s882_s1 + $0x8] sm:$0xff] }
  0xbc   : > { %v298_v35 = vld [vmem:[%s882_s1] sm:$0xff] }
  0xbd   : > { %595 = vmatpush3.xpose.msk.msra.mxu0 %vm321_vm4, %v312_v20  ;;  %v296_v34 = vld [vmem:[#allocation2] sm:$0x3] }
  0xbe   : > { %596 = vmatprep.subr.mxu0 %v718_v19  ;;  %v297_v36 = vmul.f32 0.00390625, %v296_v34  ;;  %v551_v37 = vld [vmem:[%s883_s2] ss:$0 sm:$0xff] }
  0xbf   : > { %v569_v61 = vld [vmem:[%s884_s3] ss:$0 sm:$0xff] }
  0xc0   : > { %v570_v63 = vld [vmem:[%s885_s4] ss:$0 sm:$0xff] }
  0xc1   : > { %597 = vmatpush3.xpose.msk.msra.mxu0 %vm321_vm4, %v311_v21 }
  0xc2   : > { %598 = vmatprep.subr.mxu0 %v718_v19 }
  0xc5   : > { %599 = vmatpush3.xpose.msk.msra.mxu0 %vm321_vm4, %v310_v22 }
  0xc6   : > { %600 = vmatprep.subr.mxu0 %v718_v19 }
  0xc9   : > { %601 = vmatpush3.xpose.msk.msra.mxu0 %vm321_vm4, %v309_v23 }
  0xca   : > { %602 = vmatprep.subr.mxu0 %v718_v19 }
  0xcd   : > { %603 = vmatpush3.xpose.msk.msra.mxu0 %vm321_vm4, %v308_v24 }
  0xce   : > { %604 = vmatprep.subr.mxu0 %v718_v19 }
  0xd1   : > { %605 = vmatpush3.xpose.msk.msra.mxu0 %vm321_vm4, %v307_v25 }
  0xd2   : > { %606 = vmatprep.subr.mxu0 %v718_v19 }
  0xd5   : > { %607 = vmatpush3.xpose.msk.msra.mxu0 %vm321_vm4, %v306_v26 }
  0xd6   : > { %608 = vmatprep.subr.mxu0 %v718_v19 }
  0xd9   : > { %609 = vmatpush3.xpose.msk.msra.mxu0 %vm321_vm4, %v305_v27 }
  0xda   : > { %610 = vmatprep.subr.mxu0 %v718_v19 }
  0xdd   : > { %611 = vmatpush3.xpose.msk.msra.mxu0 %vm321_vm4, %v304_v28 }
  0xde   : > { %612 = vmatprep.subr.mxu0 %v718_v19 }
  0xe1   : > { %613 = vmatpush3.xpose.msk.msra.mxu0 %vm321_vm4, %v303_v29 }
  0xe2   : > { %614 = vmatprep.subr.mxu0 %v718_v19 }
  0xe5   : > { %615 = vmatpush3.xpose.msk.msra.mxu0 %vm321_vm4, %v302_v30 }
  0xe6   : > { %616 = vmatprep.subr.mxu0 %v718_v19 }
  0xe9   : > { %617 = vmatpush3.xpose.msk.msra.mxu0 %vm321_vm4, %v301_v31 }
  0xea   : > { %618 = vmatprep.subr.mxu0 %v718_v19 }
  0xed   : > { %619 = vmatpush3.xpose.msk.msra.mxu0 %vm321_vm4, %v300_v32 }
  0xee   : > { %620 = vmatprep.subr.mxu0 %v718_v19 }
  0xf1   : > { %621 = vmatpush3.xpose.msk.msra.mxu0 %vm321_vm4, %v299_v33 }
  0xf2   : > { %622 = vmatprep.subr.mxu0 %v718_v19 }
  0xf5   : > { %623 = vmatpush3.xpose.msk.msra.mxu0 %vm321_vm4, %v298_v35 }
  0xf8   : > { %625 = vmatmul.mubr.msk.f32.vlgmr.msra.gmra.mxu0 %vm321_vm4, %v297_v36 }
 0x1b8   : > { %v439_v38 = vpop.f32.mrf.mxu0 }
 0x1b9   : > { %v440_v39 = vadd.f32 %v551_v37, %v439_v38 }
 0x1ba   : > { %v626_v40 = vpop.f32.mrf.mxu0 }
 0x1bb   : > { %v444_v41 = vsel %vm443_vm6, %v440_v39, 0.0 }
 0x1bc   : > { %v445_v42 = vrot.slane %v444_v41, 4 }
 0x1be   : > { %v446_v43 = vadd.f32 %v445_v42, %v444_v41 }
 0x1c0   : > { %v447_v44 = vrot.slane %v446_v43, 2 }
 0x1c2   : > { %v448_v45 = vadd.f32 %v447_v44, %v446_v43 }
 0x1c4   : > { %v449_v46 = vrot.slane %v448_v45, 1 }
 0x1c6   : > { %v450_v47 = vadd.f32 %v449_v46, %v448_v45 }
 0x1c8   : > { %v452_v48 = vmul.f32 0.5, %v450_v47 }
 0x1ca   : > { %v453_v49 = vsub.f32 %v440_v39, %v452_v48 }
 0x1cc   : > { %v454_v50 = vmul.f32 %v453_v49, %v453_v49 }
 0x1ce   : > { %v455_v51 = vsel %vm443_vm6, %v454_v50, 0.0 }
 0x1cf   : > { %v456_v52 = vrot.slane %v455_v51, 4 }
 0x1d1   : > { %v457_v53 = vadd.f32 %v456_v52, %v455_v51 }
 0x1d3   : > { %v458_v54 = vrot.slane %v457_v53, 2 }
 0x1d5   : > { %v459_v55 = vadd.f32 %v458_v54, %v457_v53 }
 0x1d7   : > { %v460_v56 = vrot.slane %v459_v55, 1 }
 0x1d9   : > { %v461_v57 = vadd.f32 %v460_v56, %v459_v55 }
 0x1db   : > { %v462_v58 = vmul.f32 0.5, %v461_v57 }
 0x1dd   : > { %v463_v59 = vadd.f32 1e-05, %v462_v58 }
 0x1df   : > { %661 = vrsqrt.f32 %v463_v59 }
 0x1ec   : > { %v662_v60 = vpop.eup %661 }
 0x1ed   : > { %v465_v62 = vmul.f32 %v662_v60, %v453_v49 }
 0x1ef   : > { %v473_v0 = vmul.f32 %v569_v61, %v465_v62 }
 0x1f1   : > { %v481_v1 = vadd.f32 %v570_v63, %v473_v0 }
 0x1f3   : > { %v482_v2 = vmul.f32 %v481_v1, %v481_v1 }
 0x1f5   : > { %v483_v3 = vsel %vm443_vm6, %v482_v2, 0.0 }
 0x1f6   : > { %484 = vadd.xlane.f32.xlu0 %v483_v3 }
 0x27f   : > { %v485_v4 = vpop.xlane.xlu0 %484 }
 0x280   : > { %v486_v5 = vmax.f32 %v485_v4, 1e-24 }
 0x282   : > { %663 = vrsqrt.f32 %v486_v5 }
 0x28f   : > { %v664_v6 = vpop.eup %663 }
 0x290   : > { %v488_v7 = vmul.f32 %v664_v6, %v481_v1 }
 0x292   : > { %489 = vst [vmem:[#allocation4] sm:$0x3] %v488_v7 }
 0x293 PF: > { %p631_p10 = scmp.eq.s32.totalorder %s764_s21, 1  ;;  %s720_s7 = smov [#allocation4]  }
 0x294   : > { %s497_s8 = sshll.u32 %s720_s7, 4  ;;  %s498_s8 = int_to_ptr.vmem [resolvable:$true] %s497_s8 }
 0x295   : > { %s665_s9 = scalar_lea.vmem %s498_s8, 32  ;;  %p672_p0 = scmp.lt.s32.totalorder %s498_s8, %s498_s8 }
 0x296   : > { %p666_p11 = scmp.ne.s32.totalorder %s498_s8, %s665_s9  ;;  %p673_p1 = scmp.lt.s32.totalorder %s665_s9, %s665_s9 }
 0x298   : > { %p667_p12 = pnand %p666_p11, %p631_p10  ;;  %p674_p2 = por %p673_p1, %p672_p0 }
 0x29a   : > { %p668_p13 = pneg %p667_p12 }
 0x29c   : > { %p675_p3 = pnand %p674_p2, %p668_p13 }
 0x29e   : > { %678 = shalt.err (!%p675_p3)
}
 0x29f   : > { %628 = dma.vmem_to_hbm [thread:$0]  (%p631_p10), %s498_s8, 32, %s886_s5, [#allocation5]  }
 0x2a0   : > { %702 = dma.done.wait (%p631_p10), [#allocation5], 32  }
 0x2a1   : > { %704 = vsyncadd (%p631_p10), [#allocation5], 4294967264 }
 0x2a2 PF: > { %p13_p4 = scmp.ge.s32.totalorder %s766_s22, 4   ;;  %s887_s18 = smov %s711_s19 }
 0x2a3   : > { %s888_s19 = smov %s773_s25  ;;  %s889_s20 = smov %s766_s22 }
 0x2a4   :  { %15 = sbr.rel (!%p13_p4) target bundleno = 2 (0x2), region = 121 }
 0x2a9   :  { %510 = vsyncpa [#allocation5], 1 }
 0x2aa   :  { %512 = vsyncpa [#allocation5 + $0x1], 1 }

</bundles_post_ra>
